<compile_context>
chip_gen: v7x
topology: tpu7x:2x2x1
jax: 0.10.0
libtpu: 0.0.40
codegen_flags: <defaults>
</compile_context>

<pallas_src>
import functools

import jax
import jax.numpy as jnp
from jax import lax
from jax.experimental import pallas as pl
from jax.experimental.pallas import tpu as pltpu


def transformer_kernel(x_ref, gamma_ref, beta_ref, wqkv_ref, w1_ref, b1_ref,
                       w2_ref, b2_ref, out_ref, *, heads, dim_head, n_out, eps):
    inner = heads * dim_head
    hpc = heads // n_out

    # ---- LayerNorm (f32 statistics) ----
    x = x_ref[0]                                               # (N, D) f32
    mean = jnp.mean(x, axis=-1, keepdims=True)
    xc = x - mean
    var = jnp.mean(xc * xc, axis=-1, keepdims=True)
    xn = xc * lax.rsqrt(var + eps) * gamma_ref[...] + beta_ref[...]   # (N, D)

    # ---- fused QKV projection: one wide lane-dense bf16 matmul, f32 accum ----
    # (softmax scale already folded into the Wq columns in the wrapper)
    qkv = jnp.dot(xn.astype(jnp.bfloat16), wqkv_ref[...],
                  preferred_element_type=jnp.float32)          # (N, 3*inner) f32

    # ---- split heads only for the score einsum (static lane slices + stack) ----
    def head_stack(base):
        return jnp.stack(
            [qkv[:, base + h * dim_head: base + (h + 1) * dim_head]
             for h in range(heads)], axis=0)                   # (H, N, dh) f32

    qh = head_stack(0).astype(jnp.bfloat16)
    kh = head_stack(inner).astype(jnp.bfloat16)
    vh = head_stack(2 * inner).astype(jnp.bfloat16)

    # ---- attention (softmax in f32) ----
    dots = jnp.einsum('hnd,hmd->hnm', qh, kh,
                      preferred_element_type=jnp.float32)      # (H, N, N) f32
    dots = dots - jnp.max(dots, axis=-1, keepdims=True)
    p = jnp.exp(dots)
    attn = p * pl.reciprocal(jnp.sum(p, axis=-1, keepdims=True), approx=True)
    # NOTE: attention dropout is identity in eval mode.
    o = jnp.einsum('hnm,hmd->hnd', attn.astype(jnp.bfloat16), vh,
                   preferred_element_type=jnp.float32)         # (H, N, dh) f32

    # ---- per-chunk output MLP on lane-contiguous (N, chunk_dim) slabs ----
    out_chunks = []
    for c in range(n_out):
        oc = jnp.concatenate([o[c * hpc + j] for j in range(hpc)],
                             axis=-1)                          # (N, chunk_dim)
        h1 = jnp.dot(oc.astype(jnp.bfloat16), w1_ref[c],
                     preferred_element_type=jnp.float32) + b1_ref[c]   # (N, hid)
        h1 = 0.5 * h1 * (1.0 + lax.erf(h1 * 0.7071067811865476))       # exact GELU
        y = jnp.dot(h1.astype(jnp.bfloat16), w2_ref[c],
                    preferred_element_type=jnp.float32) + b2_ref[c]    # (N, D)
        # Residual adds the LayerNorm-ed input (Attention receives ln(x)).
        out_chunks.append(xn + y)

    # Lane-dense store: pack all chunks along the last axis -> (N, n_out*D).
    out_ref[0] = jnp.concatenate(out_chunks, axis=-1).astype(out_ref.dtype)


def _vmem_limit_bytes():
    # Per-generation VMEM budget: use most of v5e/v6e's 128 MiB, keep headroom
    # below v7x's 64 MiB physical.  Conservative fallback if the query fails.
    try:
        cap = pltpu.get_tpu_info().vmem_capacity_bytes
    except Exception:
        return 48 * 1024 * 1024
    return min(int(cap) * 3 // 4, 100 * 1024 * 1024)


def transformer_forward(x, gamma, beta, wq, wk, wv, w1, b1, w2, b2,
                        *, heads, dim_head, n_out):
    B, N, D = x.shape
    inner = heads * dim_head
    chunk_dim = inner // n_out
    hidden = w1.shape[-1]
    scale = float(dim_head) ** -0.5

    # One-time weight prep (outside the kernel):
    #  * fuse Wq|Wk|Wv column-wise into one (D, 3*inner) matrix,
    #  * fold the softmax scale into the Wq columns,
    #  * cast matmul weights to bf16 (halves weight DMA; f32 accum in-kernel).
    wqkv = jnp.concatenate([wq * scale, wk, wv], axis=-1).astype(jnp.bfloat16)
    w1_b = w1.astype(jnp.bfloat16)            # (n_out, chunk_dim, hidden)
    w2_b = w2.astype(jnp.bfloat16)            # (n_out, hidden, D)

    kernel = functools.partial(transformer_kernel, heads=heads,
                               dim_head=dim_head, n_out=n_out, eps=1e-5)

    # Advisory cost estimate (lets XLA overlap surrounding ops with the kernel).
    flops = 2 * B * (N * D * 3 * inner
                     + 2 * heads * N * N * dim_head
                     + N * inner * hidden
                     + n_out * N * hidden * D)
    transcendentals = B * (heads * N * N + n_out * N * hidden)
    bytes_accessed = (4 * B * N * D
                      + 4 * B * N * n_out * D
                      + 2 * (3 * D * inner + n_out * (chunk_dim * hidden + hidden * D))
                      + 4 * (2 * D + n_out * (hidden + D)))

    out = pl.pallas_call(
        kernel,
        out_shape=jax.ShapeDtypeStruct((B, N, n_out * D), jnp.float32),
        grid_spec=pltpu.PrefetchScalarGridSpec(
            num_scalar_prefetch=0,
            grid=(B,),   # all chunk weights resident; HBM-fetched exactly once
            in_specs=[
                pl.BlockSpec((1, N, D), lambda b: (b, 0, 0)),                  # x
                pl.BlockSpec((1, D), lambda b: (0, 0)),                        # gamma
                pl.BlockSpec((1, D), lambda b: (0, 0)),                        # beta
                pl.BlockSpec((D, 3 * inner), lambda b: (0, 0)),                # Wqkv (bf16, scale folded)
                pl.BlockSpec((n_out, chunk_dim, hidden), lambda b: (0, 0, 0)), # W1 (bf16)
                pl.BlockSpec((n_out, 1, hidden), lambda b: (0, 0, 0)),         # b1
                pl.BlockSpec((n_out, hidden, D), lambda b: (0, 0, 0)),         # W2 (bf16)
                pl.BlockSpec((n_out, 1, D), lambda b: (0, 0, 0)),              # b2
            ],
            out_specs=pl.BlockSpec((1, N, n_out * D), lambda b: (b, 0, 0)),
        ),
        compiler_params=pltpu.CompilerParams(
            dimension_semantics=("parallel",),   # B=2 -> both v7x TensorCores busy
            vmem_limit_bytes=_vmem_limit_bytes()),
        cost_estimate=pl.CostEstimate(flops=flops,
                                      transcendentals=transcendentals,
                                      bytes_accessed=bytes_accessed),
    )(x, gamma, beta, wqkv, w1_b, b1, w2_b, b2)

    # Split the lane-packed result back into the n_out chunk outputs.
    return [out[:, :, c * D:(c + 1) * D] for c in range(n_out)]


def reference_forward(x, gamma, beta, wq, wk, wv, w1, b1, w2, b2,
                      *, heads, dim_head, n_out):
    """Plain-JAX f32 reference mirroring the PyTorch module (eval mode)."""
    B, N, D = x.shape
    mean = x.mean(-1, keepdims=True)
    var = ((x - mean) ** 2).mean(-1, keepdims=True)
    xn = (x - mean) / jnp.sqrt(var + 1e-5) * gamma[0] + beta[0]

    q, k, v = xn @ wq, xn @ wk, xn @ wv

    def split_heads(t):
        return t.reshape(B, N, heads, dim_head).transpose(0, 2, 1, 3)

    qh, kh, vh = map(split_heads, (q, k, v))
    dots = jnp.einsum('bhnd,bhmd->bhnm', qh, kh) * (float(dim_head) ** -0.5)
    attn = jax.nn.softmax(dots, axis=-1)
    o = jnp.einsum('bhnm,bhmd->bhnd', attn, vh)          # (B, H, N, dh)

    hpc = heads // n_out
    outs = []
    for c in range(n_out):
        e = o[:, c * hpc:(c + 1) * hpc].transpose(0, 2, 1, 3).reshape(
            B, N, hpc * dim_head)
        h1 = jax.nn.gelu(e @ w1[c] + b1[c], approximate=False)
        y = h1 @ w2[c] + b2[c]
        outs.append(xn + y)
    return outs


if __name__ == "__main__":
    # Small but representative config: dim=32, n_out=2, heads=4, dim_head=16
    B, N, D = 2, 8, 32
    heads, dim_head, n_out = 4, 16, 2
    inner = heads * dim_head
    chunk_dim = inner // n_out
    hidden = D // 2

    key = jax.random.PRNGKey(0)
    ks = jax.random.split(key, 10)

    x = jax.random.normal(ks[0], (B, N, D), dtype=jnp.float32)

    gamma = 1.0 + 0.1 * jax.random.normal(ks[1], (1, D), dtype=jnp.float32)
    beta = 0.1 * jax.random.normal(ks[2], (1, D), dtype=jnp.float32)
    wq = 0.1 * jax.random.normal(ks[3], (D, inner), dtype=jnp.float32)
    wk = 0.1 * jax.random.normal(ks[4], (D, inner), dtype=jnp.float32)
    wv = 0.1 * jax.random.normal(ks[5], (D, inner), dtype=jnp.float32)
    w1 = 0.1 * jax.random.normal(ks[6], (n_out, chunk_dim, hidden),
                                 dtype=jnp.float32)
    b1 = 0.1 * jax.random.normal(ks[7], (n_out, 1, hidden), dtype=jnp.float32)
    w2 = 0.1 * jax.random.normal(ks[8], (n_out, hidden, D), dtype=jnp.float32)
    b2 = 0.1 * jax.random.normal(ks[9], (n_out, 1, D), dtype=jnp.float32)

    outs = transformer_forward(x, gamma, beta, wq, wk, wv, w1, b1, w2, b2,
                               heads=heads, dim_head=dim_head, n_out=n_out)
    outs = jax.block_until_ready(outs)

    refs = reference_forward(x, gamma, beta, wq, wk, wv, w1, b1, w2, b2,
                             heads=heads, dim_head=dim_head, n_out=n_out)
    for o, r in zip(outs, refs):
        assert o.shape == (B, N, D)
        # Tolerance relaxed vs. the pure-f32 version: matmuls run bf16 on the
        # MXU with f32 accumulation, and the softmax denominator uses the
        # approx EUP reciprocal (per the performance review).
        err = float(jnp.max(jnp.abs(o - r)))
        assert err < 3e-2, err

    print("KERNEL_OK")
</pallas_src>

<mosaic_0001>
module attributes {stable_mosaic.version = 11 : i64} {
  func.func @transformer_kernel(%arg0: i32, %arg1: memref<1x8x32xf32, #tpu.memory_space<vmem>>, %arg2: memref<1x32xf32, #tpu.memory_space<vmem>>, %arg3: memref<1x32xf32, #tpu.memory_space<vmem>>, %arg4: memref<32x192xbf16, #tpu.memory_space<vmem>>, %arg5: memref<2x32x16xbf16, #tpu.memory_space<vmem>>, %arg6: memref<2x1x16xf32, #tpu.memory_space<vmem>>, %arg7: memref<2x16x32xbf16, #tpu.memory_space<vmem>>, %arg8: memref<2x1x32xf32, #tpu.memory_space<vmem>>, %arg9: memref<1x8x64xf32, #tpu.memory_space<vmem>>) attributes {dimension_semantics = [#tpu.dimension_semantics<parallel>], iteration_bounds = array<i64: 2>, scalar_prefetch = 0 : i64, scratch_operands = 0 : i64, tpu.core_type = #tpu.core_type<tc>, window_params = [{transform_indices = @transform_0, window_bounds = array<i64: 1, 8, 32>}, {pipeline_mode = #tpu.pipeline_mode<synchronous>, transform_indices = @transform_1, window_bounds = array<i64: 1, 32>}, {pipeline_mode = #tpu.pipeline_mode<synchronous>, transform_indices = @transform_2, window_bounds = array<i64: 1, 32>}, {pipeline_mode = #tpu.pipeline_mode<synchronous>, transform_indices = @transform_3, window_bounds = array<i64: 32, 192>}, {pipeline_mode = #tpu.pipeline_mode<synchronous>, transform_indices = @transform_4, window_bounds = array<i64: 2, 32, 16>}, {pipeline_mode = #tpu.pipeline_mode<synchronous>, transform_indices = @transform_5, window_bounds = array<i64: 2, 1, 16>}, {pipeline_mode = #tpu.pipeline_mode<synchronous>, transform_indices = @transform_6, window_bounds = array<i64: 2, 16, 32>}, {pipeline_mode = #tpu.pipeline_mode<synchronous>, transform_indices = @transform_7, window_bounds = array<i64: 2, 1, 32>}, {transform_indices = @transform_8, window_bounds = array<i64: 1, 8, 64>}]} {
    %c0 = arith.constant 0 : index
    %c0_0 = arith.constant 0 : index
    %c0_1 = arith.constant 0 : index
    %0 = vector.load %arg1[%c0, %c0_0, %c0_1] : memref<1x8x32xf32, #tpu.memory_space<vmem>>, vector<1x8x32xf32>
    %1 = vector.shape_cast %0 : vector<1x8x32xf32> to vector<8x32xf32>
    %cst = arith.constant dense<0.000000e+00> : vector<8xf32>
    %2 = vector.multi_reduction <add>, %1, %cst [1] : vector<8x32xf32> to vector<8xf32>
    %3 = vector.shape_cast %2 : vector<8xf32> to vector<8x1xf32>
    %cst_2 = arith.constant 3.200000e+01 : f32
    %4 = vector.broadcast %cst_2 : f32 to vector<8x1xf32>
    %5 = arith.divf %3, %4 : vector<8x1xf32>
    %6 = vector.broadcast %5 : vector<8x1xf32> to vector<8x32xf32>
    %7 = arith.subf %1, %6 : vector<8x32xf32>
    %8 = arith.mulf %7, %7 : vector<8x32xf32>
    %cst_3 = arith.constant dense<0.000000e+00> : vector<8xf32>
    %9 = vector.multi_reduction <add>, %8, %cst_3 [1] : vector<8x32xf32> to vector<8xf32>
    %10 = vector.shape_cast %9 : vector<8xf32> to vector<8x1xf32>
    %cst_4 = arith.constant 3.200000e+01 : f32
    %11 = vector.broadcast %cst_4 : f32 to vector<8x1xf32>
    %12 = arith.divf %10, %11 : vector<8x1xf32>
    %cst_5 = arith.constant 9.99999974E-6 : f32
    %13 = vector.broadcast %cst_5 : f32 to vector<8x1xf32>
    %14 = arith.addf %12, %13 : vector<8x1xf32>
    %15 = math.rsqrt %14 : vector<8x1xf32>
    %16 = vector.broadcast %15 : vector<8x1xf32> to vector<8x32xf32>
    %17 = arith.mulf %7, %16 : vector<8x32xf32>
    %c0_6 = arith.constant 0 : index
    %c0_7 = arith.constant 0 : index
    %18 = vector.load %arg2[%c0_6, %c0_7] : memref<1x32xf32, #tpu.memory_space<vmem>>, vector<1x32xf32>
    %19 = vector.broadcast %18 : vector<1x32xf32> to vector<8x32xf32>
    %20 = arith.mulf %17, %19 : vector<8x32xf32>
    %c0_8 = arith.constant 0 : index
    %c0_9 = arith.constant 0 : index
    %21 = vector.load %arg3[%c0_8, %c0_9] : memref<1x32xf32, #tpu.memory_space<vmem>>, vector<1x32xf32>
    %22 = vector.broadcast %21 : vector<1x32xf32> to vector<8x32xf32>
    %23 = arith.addf %20, %22 : vector<8x32xf32>
    %24 = arith.truncf %23 : vector<8x32xf32> to vector<8x32xbf16>
    %c0_10 = arith.constant 0 : index
    %c0_11 = arith.constant 0 : index
    %25 = vector.load %arg4[%c0_10, %c0_11] : memref<32x192xbf16, #tpu.memory_space<vmem>>, vector<32x192xbf16>
    %cst_12 = arith.constant dense<0.000000e+00> : vector<8x192xf32>
    %26 = tpu.matmul %24, %25, %cst_12 {dimension_numbers = #tpu.dot_dimension_numbers<[1], [0], [0], [1], [0, 0, 1, 1], [], []>} : vector<8x32xbf16>, vector<32x192xbf16>, vector<8x192xf32> -> vector<8x192xf32>
    %27 = vector.extract_strided_slice %26 {offsets = [0, 0], sizes = [8, 16], strides = [1, 1]} : vector<8x192xf32> to vector<8x16xf32>
    %28 = vector.extract_strided_slice %26 {offsets = [0, 16], sizes = [8, 16], strides = [1, 1]} : vector<8x192xf32> to vector<8x16xf32>
    %29 = vector.extract_strided_slice %26 {offsets = [0, 32], sizes = [8, 16], strides = [1, 1]} : vector<8x192xf32> to vector<8x16xf32>
    %30 = vector.extract_strided_slice %26 {offsets = [0, 48], sizes = [8, 16], strides = [1, 1]} : vector<8x192xf32> to vector<8x16xf32>
    %31 = vector.shape_cast %27 : vector<8x16xf32> to vector<1x8x16xf32>
    %32 = vector.shape_cast %28 : vector<8x16xf32> to vector<1x8x16xf32>
    %33 = vector.shape_cast %29 : vector<8x16xf32> to vector<1x8x16xf32>
    %34 = vector.shape_cast %30 : vector<8x16xf32> to vector<1x8x16xf32>
    %35 = tpu.concatenate %31, %32, %33, %34 in 0 : vector<1x8x16xf32>, vector<1x8x16xf32>, vector<1x8x16xf32>, vector<1x8x16xf32> -> vector<4x8x16xf32>
    %36 = arith.truncf %35 : vector<4x8x16xf32> to vector<4x8x16xbf16>
    %37 = vector.extract_strided_slice %26 {offsets = [0, 64], sizes = [8, 16], strides = [1, 1]} : vector<8x192xf32> to vector<8x16xf32>
    %38 = vector.extract_strided_slice %26 {offsets = [0, 80], sizes = [8, 16], strides = [1, 1]} : vector<8x192xf32> to vector<8x16xf32>
    %39 = vector.extract_strided_slice %26 {offsets = [0, 96], sizes = [8, 16], strides = [1, 1]} : vector<8x192xf32> to vector<8x16xf32>
    %40 = vector.extract_strided_slice %26 {offsets = [0, 112], sizes = [8, 16], strides = [1, 1]} : vector<8x192xf32> to vector<8x16xf32>
    %41 = vector.shape_cast %37 : vector<8x16xf32> to vector<1x8x16xf32>
    %42 = vector.shape_cast %38 : vector<8x16xf32> to vector<1x8x16xf32>
    %43 = vector.shape_cast %39 : vector<8x16xf32> to vector<1x8x16xf32>
    %44 = vector.shape_cast %40 : vector<8x16xf32> to vector<1x8x16xf32>
    %45 = tpu.concatenate %41, %42, %43, %44 in 0 : vector<1x8x16xf32>, vector<1x8x16xf32>, vector<1x8x16xf32>, vector<1x8x16xf32> -> vector<4x8x16xf32>
    %46 = arith.truncf %45 : vector<4x8x16xf32> to vector<4x8x16xbf16>
    %47 = vector.extract_strided_slice %26 {offsets = [0, 128], sizes = [8, 16], strides = [1, 1]} : vector<8x192xf32> to vector<8x16xf32>
    %48 = vector.extract_strided_slice %26 {offsets = [0, 144], sizes = [8, 16], strides = [1, 1]} : vector<8x192xf32> to vector<8x16xf32>
    %49 = vector.extract_strided_slice %26 {offsets = [0, 160], sizes = [8, 16], strides = [1, 1]} : vector<8x192xf32> to vector<8x16xf32>
    %50 = vector.extract_strided_slice %26 {offsets = [0, 176], sizes = [8, 16], strides = [1, 1]} : vector<8x192xf32> to vector<8x16xf32>
    %51 = vector.shape_cast %47 : vector<8x16xf32> to vector<1x8x16xf32>
    %52 = vector.shape_cast %48 : vector<8x16xf32> to vector<1x8x16xf32>
    %53 = vector.shape_cast %49 : vector<8x16xf32> to vector<1x8x16xf32>
    %54 = vector.shape_cast %50 : vector<8x16xf32> to vector<1x8x16xf32>
    %55 = tpu.concatenate %51, %52, %53, %54 in 0 : vector<1x8x16xf32>, vector<1x8x16xf32>, vector<1x8x16xf32>, vector<1x8x16xf32> -> vector<4x8x16xf32>
    %56 = arith.truncf %55 : vector<4x8x16xf32> to vector<4x8x16xbf16>
    "tpu.trace_start"() <{level = 10 : i32, message = "hnd,hmd->hnm"}> : () -> ()
    %cst_13 = arith.constant dense<0.000000e+00> : vector<4x8x8xf32>
    %57 = tpu.matmul %36, %46, %cst_13 {dimension_numbers = #tpu.dot_dimension_numbers<[2], [2], [1], [1], [0, 0, 0, 1, 1, 1], [0], [0]>} : vector<4x8x16xbf16>, vector<4x8x16xbf16>, vector<4x8x8xf32> -> vector<4x8x8xf32>
    "tpu.trace_stop"() : () -> ()
    %cst_14 = arith.constant dense<0xFF800000> : vector<4x8xf32>
    %58 = vector.multi_reduction <maximumf>, %57, %cst_14 [2] : vector<4x8x8xf32> to vector<4x8xf32>
    %59 = vector.shape_cast %58 : vector<4x8xf32> to vector<4x8x1xf32>
    %60 = vector.broadcast %59 : vector<4x8x1xf32> to vector<4x8x8xf32>
    %61 = arith.subf %57, %60 : vector<4x8x8xf32>
    %62 = math.exp %61 : vector<4x8x8xf32>
    %cst_15 = arith.constant dense<0.000000e+00> : vector<4x8xf32>
    %63 = vector.multi_reduction <add>, %62, %cst_15 [2] : vector<4x8x8xf32> to vector<4x8xf32>
    %64 = vector.shape_cast %63 : vector<4x8xf32> to vector<4x8x1xf32>
    %65 = tpu.reciprocal %64 {approx = true} : vector<4x8x1xf32> -> vector<4x8x1xf32>
    %66 = vector.broadcast %65 : vector<4x8x1xf32> to vector<4x8x8xf32>
    %67 = arith.mulf %62, %66 : vector<4x8x8xf32>
    %68 = arith.truncf %67 : vector<4x8x8xf32> to vector<4x8x8xbf16>
    "tpu.trace_start"() <{level = 10 : i32, message = "hnm,hmd->hnd"}> : () -> ()
    %cst_16 = arith.constant dense<0.000000e+00> : vector<4x8x16xf32>
    %69 = tpu.matmul %68, %56, %cst_16 {dimension_numbers = #tpu.dot_dimension_numbers<[2], [1], [1], [2], [0, 0, 0, 1, 1, 2], [0], [0]>} : vector<4x8x8xbf16>, vector<4x8x16xbf16>, vector<4x8x16xf32> -> vector<4x8x16xf32>
    "tpu.trace_stop"() : () -> ()
    %70 = vector.extract_strided_slice %69 {offsets = [0, 0, 0], sizes = [1, 8, 16], strides = [1, 1, 1]} : vector<4x8x16xf32> to vector<1x8x16xf32>
    %71 = vector.shape_cast %70 : vector<1x8x16xf32> to vector<8x16xf32>
    %72 = vector.extract_strided_slice %69 {offsets = [1, 0, 0], sizes = [1, 8, 16], strides = [1, 1, 1]} : vector<4x8x16xf32> to vector<1x8x16xf32>
    %73 = vector.shape_cast %72 : vector<1x8x16xf32> to vector<8x16xf32>
    %74 = tpu.concatenate %71, %73 in 1 : vector<8x16xf32>, vector<8x16xf32> -> vector<8x32xf32>
    %75 = arith.truncf %74 : vector<8x32xf32> to vector<8x32xbf16>
    %c0_17 = arith.constant 0 : index
    %c0_18 = arith.constant 0 : index
    %c0_19 = arith.constant 0 : index
    %76 = vector.load %arg5[%c0_17, %c0_18, %c0_19] : memref<2x32x16xbf16, #tpu.memory_space<vmem>>, vector<1x32x16xbf16>
    %77 = vector.shape_cast %76 : vector<1x32x16xbf16> to vector<32x16xbf16>
    %cst_20 = arith.constant dense<0.000000e+00> : vector<8x16xf32>
    %78 = tpu.matmul %75, %77, %cst_20 {dimension_numbers = #tpu.dot_dimension_numbers<[1], [0], [0], [1], [0, 0, 1, 1], [], []>} : vector<8x32xbf16>, vector<32x16xbf16>, vector<8x16xf32> -> vector<8x16xf32>
    %c0_21 = arith.constant 0 : index
    %c0_22 = arith.constant 0 : index
    %c0_23 = arith.constant 0 : index
    %79 = vector.load %arg6[%c0_21, %c0_22, %c0_23] : memref<2x1x16xf32, #tpu.memory_space<vmem>>, vector<1x1x16xf32>
    %80 = vector.shape_cast %79 : vector<1x1x16xf32> to vector<1x16xf32>
    %81 = vector.broadcast %80 : vector<1x16xf32> to vector<8x16xf32>
    %82 = arith.addf %78, %81 : vector<8x16xf32>
    %cst_24 = arith.constant 5.000000e-01 : f32
    %83 = vector.broadcast %cst_24 : f32 to vector<8x16xf32>
    %84 = arith.mulf %83, %82 : vector<8x16xf32>
    %cst_25 = arith.constant 0.707106769 : f32
    %85 = vector.broadcast %cst_25 : f32 to vector<8x16xf32>
    %86 = arith.mulf %82, %85 : vector<8x16xf32>
    %87 = math.erf %86 : vector<8x16xf32>
    %cst_26 = arith.constant 1.000000e+00 : f32
    %88 = vector.broadcast %cst_26 : f32 to vector<8x16xf32>
    %89 = arith.addf %88, %87 : vector<8x16xf32>
    %90 = arith.mulf %84, %89 : vector<8x16xf32>
    %91 = arith.truncf %90 : vector<8x16xf32> to vector<8x16xbf16>
    %c0_27 = arith.constant 0 : index
    %c0_28 = arith.constant 0 : index
    %c0_29 = arith.constant 0 : index
    %92 = vector.load %arg7[%c0_27, %c0_28, %c0_29] : memref<2x16x32xbf16, #tpu.memory_space<vmem>>, vector<1x16x32xbf16>
    %93 = vector.shape_cast %92 : vector<1x16x32xbf16> to vector<16x32xbf16>
    %cst_30 = arith.constant dense<0.000000e+00> : vector<8x32xf32>
    %94 = tpu.matmul %91, %93, %cst_30 {dimension_numbers = #tpu.dot_dimension_numbers<[1], [0], [0], [1], [0, 0, 1, 1], [], []>} : vector<8x16xbf16>, vector<16x32xbf16>, vector<8x32xf32> -> vector<8x32xf32>
    %c0_31 = arith.constant 0 : index
    %c0_32 = arith.constant 0 : index
    %c0_33 = arith.constant 0 : index
    %95 = vector.load %arg8[%c0_31, %c0_32, %c0_33] : memref<2x1x32xf32, #tpu.memory_space<vmem>>, vector<1x1x32xf32>
    %96 = vector.shape_cast %95 : vector<1x1x32xf32> to vector<1x32xf32>
    %97 = vector.broadcast %96 : vector<1x32xf32> to vector<8x32xf32>
    %98 = arith.addf %94, %97 : vector<8x32xf32>
    %99 = arith.addf %23, %98 : vector<8x32xf32>
    %100 = vector.extract_strided_slice %69 {offsets = [2, 0, 0], sizes = [1, 8, 16], strides = [1, 1, 1]} : vector<4x8x16xf32> to vector<1x8x16xf32>
    %101 = vector.shape_cast %100 : vector<1x8x16xf32> to vector<8x16xf32>
    %102 = vector.extract_strided_slice %69 {offsets = [3, 0, 0], sizes = [1, 8, 16], strides = [1, 1, 1]} : vector<4x8x16xf32> to vector<1x8x16xf32>
    %103 = vector.shape_cast %102 : vector<1x8x16xf32> to vector<8x16xf32>
    %104 = tpu.concatenate %101, %103 in 1 : vector<8x16xf32>, vector<8x16xf32> -> vector<8x32xf32>
    %105 = arith.truncf %104 : vector<8x32xf32> to vector<8x32xbf16>
    %c1 = arith.constant 1 : index
    %c0_34 = arith.constant 0 : index
    %c0_35 = arith.constant 0 : index
    %106 = vector.load %arg5[%c1, %c0_34, %c0_35] : memref<2x32x16xbf16, #tpu.memory_space<vmem>>, vector<1x32x16xbf16>
    %107 = vector.shape_cast %106 : vector<1x32x16xbf16> to vector<32x16xbf16>
    %cst_36 = arith.constant dense<0.000000e+00> : vector<8x16xf32>
    %108 = tpu.matmul %105, %107, %cst_36 {dimension_numbers = #tpu.dot_dimension_numbers<[1], [0], [0], [1], [0, 0, 1, 1], [], []>} : vector<8x32xbf16>, vector<32x16xbf16>, vector<8x16xf32> -> vector<8x16xf32>
    %c1_37 = arith.constant 1 : index
    %c0_38 = arith.constant 0 : index
    %c0_39 = arith.constant 0 : index
    %109 = vector.load %arg6[%c1_37, %c0_38, %c0_39] : memref<2x1x16xf32, #tpu.memory_space<vmem>>, vector<1x1x16xf32>
    %110 = vector.shape_cast %109 : vector<1x1x16xf32> to vector<1x16xf32>
    %111 = vector.broadcast %110 : vector<1x16xf32> to vector<8x16xf32>
    %112 = arith.addf %108, %111 : vector<8x16xf32>
    %cst_40 = arith.constant 5.000000e-01 : f32
    %113 = vector.broadcast %cst_40 : f32 to vector<8x16xf32>
    %114 = arith.mulf %113, %112 : vector<8x16xf32>
    %cst_41 = arith.constant 0.707106769 : f32
    %115 = vector.broadcast %cst_41 : f32 to vector<8x16xf32>
    %116 = arith.mulf %112, %115 : vector<8x16xf32>
    %117 = math.erf %116 : vector<8x16xf32>
    %cst_42 = arith.constant 1.000000e+00 : f32
    %118 = vector.broadcast %cst_42 : f32 to vector<8x16xf32>
    %119 = arith.addf %118, %117 : vector<8x16xf32>
    %120 = arith.mulf %114, %119 : vector<8x16xf32>
    %121 = arith.truncf %120 : vector<8x16xf32> to vector<8x16xbf16>
    %c1_43 = arith.constant 1 : index
    %c0_44 = arith.constant 0 : index
    %c0_45 = arith.constant 0 : index
    %122 = vector.load %arg7[%c1_43, %c0_44, %c0_45] : memref<2x16x32xbf16, #tpu.memory_space<vmem>>, vector<1x16x32xbf16>
    %123 = vector.shape_cast %122 : vector<1x16x32xbf16> to vector<16x32xbf16>
    %cst_46 = arith.constant dense<0.000000e+00> : vector<8x32xf32>
    %124 = tpu.matmul %121, %123, %cst_46 {dimension_numbers = #tpu.dot_dimension_numbers<[1], [0], [0], [1], [0, 0, 1, 1], [], []>} : vector<8x16xbf16>, vector<16x32xbf16>, vector<8x32xf32> -> vector<8x32xf32>
    %c1_47 = arith.constant 1 : index
    %c0_48 = arith.constant 0 : index
    %c0_49 = arith.constant 0 : index
    %125 = vector.load %arg8[%c1_47, %c0_48, %c0_49] : memref<2x1x32xf32, #tpu.memory_space<vmem>>, vector<1x1x32xf32>
    %126 = vector.shape_cast %125 : vector<1x1x32xf32> to vector<1x32xf32>
    %127 = vector.broadcast %126 : vector<1x32xf32> to vector<8x32xf32>
    %128 = arith.addf %124, %127 : vector<8x32xf32>
    %129 = arith.addf %23, %128 : vector<8x32xf32>
    %130 = tpu.concatenate %99, %129 in 1 : vector<8x32xf32>, vector<8x32xf32> -> vector<8x64xf32>
    %c0_50 = arith.constant 0 : index
    %c0_51 = arith.constant 0 : index
    %c0_52 = arith.constant 0 : index
    %131 = vector.load %arg9[%c0_50, %c0_51, %c0_52] : memref<1x8x64xf32, #tpu.memory_space<vmem>>, vector<1x8x64xf32>
    %132 = vector.shape_cast %131 : vector<1x8x64xf32> to vector<8x64xf32>
    %133 = vector.shape_cast %130 : vector<8x64xf32> to vector<1x8x64xf32>
    tpu.vector_store %arg9[%c0_50, %c0_51, %c0_52], %133 {strides = array<i32>} : memref<1x8x64xf32, #tpu.memory_space<vmem>>, vector<1x8x64xf32>,
    return
  }
  func.func @transform_0(%arg0: i32) -> (i32, i32, i32) {
    %c0_i32 = arith.constant 0 : i32
    %c0_i32_0 = arith.constant 0 : i32
    %c0_i32_1 = arith.constant 0 : i32
    return %arg0, %c0_i32, %c0_i32_0 : i32, i32, i32
  }
  func.func @transform_1(%arg0: i32) -> (i32, i32) {
    %c0_i32 = arith.constant 0 : i32
    %c0_i32_0 = arith.constant 0 : i32
    %c0_i32_1 = arith.constant 0 : i32
    return %c0_i32, %c0_i32_0 : i32, i32
  }
  func.func @transform_2(%arg0: i32) -> (i32, i32) {
    %c0_i32 = arith.constant 0 : i32
    %c0_i32_0 = arith.constant 0 : i32
    %c0_i32_1 = arith.constant 0 : i32
    return %c0_i32, %c0_i32_0 : i32, i32
  }
  func.func @transform_3(%arg0: i32) -> (i32, i32) {
    %c0_i32 = arith.constant 0 : i32
    %c0_i32_0 = arith.constant 0 : i32
    %c0_i32_1 = arith.constant 0 : i32
    return %c0_i32, %c0_i32_0 : i32, i32
  }
  func.func @transform_4(%arg0: i32) -> (i32, i32, i32) {
    %c0_i32 = arith.constant 0 : i32
    %c0_i32_0 = arith.constant 0 : i32
    %c0_i32_1 = arith.constant 0 : i32
    %c0_i32_2 = arith.constant 0 : i32
    return %c0_i32, %c0_i32_0, %c0_i32_1 : i32, i32, i32
  }
  func.func @transform_5(%arg0: i32) -> (i32, i32, i32) {
    %c0_i32 = arith.constant 0 : i32
    %c0_i32_0 = arith.constant 0 : i32
    %c0_i32_1 = arith.constant 0 : i32
    %c0_i32_2 = arith.constant 0 : i32
    return %c0_i32, %c0_i32_0, %c0_i32_1 : i32, i32, i32
  }
  func.func @transform_6(%arg0: i32) -> (i32, i32, i32) {
    %c0_i32 = arith.constant 0 : i32
    %c0_i32_0 = arith.constant 0 : i32
    %c0_i32_1 = arith.constant 0 : i32
    %c0_i32_2 = arith.constant 0 : i32
    return %c0_i32, %c0_i32_0, %c0_i32_1 : i32, i32, i32
  }
  func.func @transform_7(%arg0: i32) -> (i32, i32, i32) {
    %c0_i32 = arith.constant 0 : i32
    %c0_i32_0 = arith.constant 0 : i32
    %c0_i32_1 = arith.constant 0 : i32
    %c0_i32_2 = arith.constant 0 : i32
    return %c0_i32, %c0_i32_0, %c0_i32_1 : i32, i32, i32
  }
  func.func @transform_8(%arg0: i32) -> (i32, i32, i32) {
    %c0_i32 = arith.constant 0 : i32
    %c0_i32_0 = arith.constant 0 : i32
    %c0_i32_1 = arith.constant 0 : i32
    return %arg0, %c0_i32, %c0_i32_0 : i32, i32, i32
  }
}

</mosaic_0001>

<bundles_post_ra>
// kernel: tpu_custom_call.1
= control target key start
LH: loop header
LB: loop body
LE: loop exit
PB: predicated region body
PF: predicated region fallthrough
CT: control target
= control target key end

     0   :  { %13 = vsyncpa [#allocation3], 0  ;;  %s2015_s0 = inlined_call_operand.vmem [shape: f32[2,8,32], index: 0, kind: input, shape index: {}]   ;;  %s2016_s1 = inlined_call_operand.hbm [shape: f32[1,32], index: 1, kind: input, shape index: {}]   ;;  %s2017_s2 = inlined_call_operand.hbm [shape: f32[1,32], index: 2, kind: input, shape index: {}]   ;;  %s2018_s3 = inlined_call_operand.vmem [shape: bf16[32,192], index: 3, kind: input, shape index: {}]   ;;  %s2019_s4 = inlined_call_operand.vmem [shape: bf16[2,32,16], index: 4, kind: input, shape index: {}]   ;;  %s2020_s5 = inlined_call_operand.vmem [shape: f32[2,1,16], index: 5, kind: input, shape index: {}]   ;;  %s2021_s6 = inlined_call_operand.vmem [shape: bf16[2,16,32], index: 6, kind: input, shape index: {}]   ;;  %s2022_s7 = inlined_call_operand.vmem [shape: f32[2,1,32], index: 7, kind: input, shape index: {}]   ;;  %s2023_s8 = inlined_call_operand.hbm [shape: f32[2,8,64], index: 8, kind: output, shape index: {}]  }
   0x1   :  { %14 = vsyncpa [#allocation6], 0 }
   0x2   :  { %15 = vsyncpa [#allocation4], 0 }
   0x3   :  { %17 = vsyncpa [#allocation4 + $0x1], 0  ;;  %s1709_s27 = smov 0   ;;  %s1711_s28 = smov 0  }
   0x4   :  { %s1713_s29 = smov 0   ;;  %s1715_s30 = smov 0  }
   0x5 LB: > { %s1730_s9 = sadd.s32 4294967295, %s1650_s30   ;;  %s1268_s10 = sadd.s32 4294967294, %s1650_s30   ;;  %s1650_s30 = sphi %s1715_s30, %s2041_s30   ;;  %s1646_s29 = sphi %s1713_s29, %s2040_s29   ;;  %s1642_s28 = sphi %s1711_s28, %s2039_s28   ;;  %s1638_s27 = sphi %s1709_s27, %s2038_s27  }
   0x6   : > { %s1734_s11 = sadd.s32 1, %s1650_s30   ;;  %s203_s12 = sadd.s32 1, %s1646_s29 }
   0x7   : > { %s200_s13 = ssub.s32 %s1650_s30, %s1734_s11  ;;  %p213_p0 = scmp.ne.s32.totalorder %s1646_s29, %s1642_s28 }
   0x8   : > { %p201_p1 = scmp.eq.s32.totalorder %s200_s13, 0  ;;  %p214_p2 = scmp.eq.s32.totalorder %s1730_s9, 1 }
   0x9   : > { %p219_p3 = scmp.ne.s32.totalorder %s1642_s28, %s1638_s27  ;;  %p220_p4 = scmp.eq.s32.totalorder %s1268_s10, 1 }
   0xa   : > { %s1745_s14 = scalar_select %p201_p1, %s1646_s29, %s203_s12  }
   0xb   : > { %p1747_p5 = por %p214_p2, %p213_p0  ;;  %p1751_p6 = por %p220_p4, %p219_p3 }
   0xc   : > { %p1269_p7 = scmp.ge.s32.totalorder %s1650_s30, 1  ;;  %p227_p8 = scmp.lt.s32.totalorder %s1650_s30, 3 }
   0xd   : > { %s2027_s15 = scalar_select %p1747_p5, 1, 0 }
   0xe   : > { %s2028_s16 = scalar_select %p1751_p6, 1, 0 }
   0xf   : > { %p2024_p9 = scmp.eq.s32.totalorder %s1730_s9, 0  ;;  %p1758_p10 = pnand %p1269_p7, %p227_p8 }
  0x10   : > { %s1652_s18 = smov [#allocation2]   ;;  %s1653_s20 = smov [#allocation5]  }
  0x11   : > { %s2029_s17 = scalar_select %p1758_p10, 1, 0 }
  0x12   : > { %s240_s19 = sshll.u32 %s1652_s18, 4  ;;  %p1431_p11 = pneg %p1758_p10  ;;  %s241_s19 = int_to_ptr.vmem [resolvable:$true] %s240_s19 }
  0x13   : > { %s251_s21 = sshll.u32 %s1653_s20, 4  ;;  %s1524_s25 = scalar_lea.hbm %s2016_s1, 16  ;;  %s1770_s21 = int_to_ptr.vmem [resolvable:$true] %s251_s21 }
  0x14   : > { %p1766_p12 = pnand %p2024_p9, %p1431_p11  ;;  %p1525_p13 = scmp.ne.s32.totalorder %s2016_s1, %s1524_s25 }
  0x15   : > { %p1531_p3 = scmp.lt.u32.totalorder %s1524_s25, %s2016_s1 }
  0x16   : > { %p1526_p0 = pneg %p1766_p12 }
  0x18   : > { %p1527_p1 = pnand %p1526_p0, %p1525_p13 }
  0x1a   : > { %p1528_p2 = pneg %p1527_p1 }
  0x1c   : > { %p1533_p4 = pnand %p1531_p3, %p1528_p2 }
  0x1e   : > { %1536 = shalt.err (!%p1533_p4)
}
  0x1f   : > { %s1537_s18 = scalar_lea.vmem %s241_s19, 16  ;;  %s1544_s20 = scalar_lea.vmem %s241_s19, 32 }
  0x20   : > { %p1538_p7 = scmp.ne.s32.totalorder %s241_s19, %s1537_s18  ;;  %p1545_p9 = scmp.lt.s32.totalorder %s241_s19, %s241_s19 }
  0x21   : > { %p1546_p6 = scmp.lt.s32.totalorder %s1544_s20, %s1537_s18 }
  0x22   : > { %p1540_p8 = pnand %p1538_p7, %p1526_p0 }
  0x23   : > { %p1547_p5 = por %p1546_p6, %p1545_p9 }
  0x24   : > { %p1541_p11 = pneg %p1540_p8 }
  0x26   : > { %p1548_p10 = pnand %p1547_p5, %p1541_p11 }
  0x28   : > { %1551 = shalt.err (!%p1548_p10)
}
  0x29   : > { %1434 = dma.hbm_to_vmem [thread:$0]  (!%p1766_p12), %s2016_s1, 16, %s241_s19, [#allocation3]  }
  0x2a   : > { %s1552_s10 = scalar_lea.hbm %s2017_s2, 16 }
  0x2b   : > { %p1553_p13 = scmp.ne.s32.totalorder %s2017_s2, %s1552_s10  ;;  %p1559_p9 = scmp.lt.u32.totalorder %s1552_s10, %s2017_s2 }
  0x2d   : > { %p1555_p6 = pnand %p1553_p13, %p1526_p0 }
  0x2f   : > { %p1556_p5 = pneg %p1555_p6 }
  0x31   : > { %p1561_p10 = pnand %p1559_p9, %p1556_p5 }
  0x33   : > { %1564 = shalt.err (!%p1561_p10)
}
  0x34   : > { %s1565_s19 = scalar_lea.vmem %s1770_s21, 16  ;;  %s1572_s23 = scalar_lea.vmem %s1770_s21, 32 }
  0x35   : > { %p1566_p1 = scmp.ne.s32.totalorder %s1770_s21, %s1565_s19  ;;  %p1573_p4 = scmp.lt.s32.totalorder %s1770_s21, %s1770_s21 }
  0x36   : > { %p1574_p7 = scmp.lt.s32.totalorder %s1572_s23, %s1565_s19 }
  0x37   : > { %p1568_p2 = pnand %p1566_p1, %p1526_p0 }
  0x38   : > { %p1575_p8 = por %p1574_p7, %p1573_p4 }
  0x39   : > { %p1569_p3 = pneg %p1568_p2 }
  0x3b   : > { %p1576_p11 = pnand %p1575_p8, %p1569_p3 }
  0x3d   : > { %1579 = shalt.err (!%p1576_p11)
}
  0x3e   : > { %1437 = dma.hbm_to_vmem [thread:$0]  (!%p1766_p12), %s2017_s2, 16, %s1770_s21, [#allocation6]  }
  0x3f   : > { %p2031_p13 = scmp.ne.s32.totalorder %s2029_s17, 0 }
  0x40   : > { %p2032_p0 = scmp.eq.s32.totalorder (!%p2031_p13), %s1730_s9, 0 }
  0x41   : > { %286 = sbr.rel (%p2031_p13) target bundleno = 2295 (0x8f7), region = 52 }
  0x48   : > { %1625 = dma.done.wait (%p2032_p0), [#allocation3], 16   ;;  %p2033_p6 = pmov %p2032_p0 }
  0x49   : > { %p2034_p5 = pmov %p2032_p0 }
  0x4a   : > { %1627 = vsyncadd (%p2033_p6), [#allocation3], 4294967280 }
  0x4b   : > { %1629 = dma.done.wait (%p2034_p5), [#allocation6], 16   ;;  %p2035_p9 = pmov %p2032_p0 }
  0x4c   : > { %p323_p10 = scmp.lt.s32.totalorder %s1730_s9, 1  ;;  %vm329_vm0 = vcmask 261120   ;;  %v1490_v7 = vld [vmem:[%s2018_s3 + $0x4] ss:$8 sps:$4 sm:$0xff]   ;;  %v1492_v8 = vld [vmem:[%s2018_s3] ss:$8 sps:$4 sm:$0xff]  }
  0x4d   : > { %1631 = vsyncadd (%p2035_p9), [#allocation6], 4294967280  ;;  %388 = vmatprep.subr.bf16.mxu0 %v1490_v7  ;;  %v1493_v9 = vld [vmem:[%s2018_s3 + $0x14] ss:$8 sps:$4 sm:$0xff]   ;;  %v1495_v10 = vld [vmem:[%s2018_s3 + $0x10] ss:$8 sps:$4 sm:$0xff]  }
  0x4e   : > { %s324_s22 = scalar_select %p323_p10, %s1730_s9, 1  ;;  %389 = vmatpush1.bf16.msra.mxu0 %v1492_v8  ;;  %v1654_v11 = vmov 0   ;;  %v1278_v16 = vld [vmem:[#allocation2] ss:$0 sm:$0xff]  ;;  %v1279_v18 = vld [vmem:[#allocation5] ss:$0 sm:$0xff] }
  0x4f   : > { %420 = vmatprep.mubr.bf16.mxu0 %v1654_v11  ;;  %390 = vmatprep.subr.bf16.mxu0 %v1493_v9  ;;  %s1657_s26 = smov 96   ;;  %v1658_v26 = vmov 0.0   ;;  %vm1659_vm1 = vmmov 0   ;;  %s1660_s17 = smov 64   ;;  %vm460_vm2 = vcmask 130048   ;;  %vm706_vm3 = vcmask 1043456  }
  0x50   : > { %s1277_s21 = sshll.u32 %s324_s22, 3  ;;  %s1655_s22 = smov 112   ;;  %1345 = vmatprep.subr.bf16.mxu1 %v1658_v26  ;;  %1347 = vmatprep.mubr.msk.bf16.mxu1 %vm1659_vm1, %v1658_v26  ;;  %vm654_vm4 = vcmask 64512   ;;  %vm1171_vm5 = vcmask 523264  }
  0x51   : > { %s326_s10 = scalar_lea.vmem %s2015_s0, %s1277_s21  ;;  %s1656_s21 = smov 80  }
  0x52   : > { %v328_v0 = vld [vmem:[%s326_s10] sm:$0xff]  ;;  %391 = vmatpush1.bf16.msra.mxu0 %v1495_v10  ;;  %s1661_s20 = smov 16   ;;  %s1662_s23 = smov 32  }
  0x53   : > { %v330_v1 = vsel %vm329_vm0, %v328_v0, 0.0  ;;  %1351 = vmatprep.subr.bf16.mxu0 %v1658_v26  ;;  %s320_s24 = sand.u32 1, %s1642_s28   ;;  %p2036_p1 = scmp.ne.s32.totalorder %s2027_s15, 0 }
  0x54   : > { %331 = vadd.xlane.f32.xlu0 %v330_v1  ;;  %s1276_s25 = sshll.u32 %s320_s24, 3  ;;  %s1663_s19 = smov [#allocation7]  }
  0xe1   : > { %v332_v2 = vpop.xlane.xlu0 %331 }
  0xe2   : > { %v334_v3 = vmul.f32 0.03125, %v332_v2 }
  0xe4   : > { %v335_v4 = vsub.f32 %v328_v0, %v334_v3 }
  0xe6   : > { %v336_v5 = vmul.f32 %v335_v4, %v335_v4 }
  0xe8   : > { %v337_v6 = vsel %vm329_vm0, %v336_v5, 0.0 }
  0xe9   : > { %338 = vadd.xlane.f32.xlu0 %v337_v6 }
 0x176   : > { %v339_v12 = vpop.xlane.xlu0 %338 }
 0x177   : > { %v340_v13 = vmul.f32 0.03125, %v339_v12 }
 0x179   : > { %v341_v14 = vadd.f32 1e-05, %v340_v13 }
 0x17b   : > { %1502 = vrsqrt.f32 %v341_v14 }
 0x185   : > { %v1503_v15 = vpop.eup %1502 }
 0x186   : > { %v343_v17 = vmul.f32 %v1503_v15, %v335_v4 }
 0x188   : > { %v351_v19 = vmul.f32 %v1278_v16, %v343_v17 }
 0x18a   : > { %v1849_v20 = vadd.f32 %v1279_v18, %v351_v19 }
 0x18c   : > { %v360_v21 = vpack.c.bf16 %v1849_v20, %v1849_v20 }
 0x18e   : > { %1284 = vmatmul.mubr.msk.bf16.vlgmr.msra.gmra.mrb[0].mxu0 %vm329_vm0, %v360_v21 }
 0x18f   : > { %1353 = vmatprep.mubr.msk.bf16.mxu0 %vm1659_vm1, %v1658_v26 }
 0x261   : > { %v422_v22 = vpop.f32.mrb[0].mxu0 }
 0x262   : > { %430 = vrot.lane.b32.xlu1 %v422_v22, %s1655_s22  ;;  %v1855_v23 = vpop.f32.mrb[1].mxu0  ;;  %v439_v31 = vpack.c.bf16 %v422_v22, %v422_v22 }
 0x263   : > { %v426_v24 = vpop.f32.mrb[2].mxu0  ;;  %v453_v42 = vpack.c.bf16 %v1855_v23, %v1855_v23 }
 0x264   : > { %v427_v25 = vpop.f32.mrb[3].mxu0 }
 0x265   : > { %v708_v43 = vsel %vm706_vm3, %v453_v42, 0 }
 0x266   : > { %436 = vrot.lane.b32.xlu1 %v422_v22, %s1656_s21 }
 0x26a   : > { %433 = vrot.lane.b32.xlu1 %v422_v22, %s1657_s26 }
 0x2d4   : > { %v431_v27 = vpop.permute.xlu1 %430 }
 0x2d5   : > { %v440_v28 = vpack.c.bf16 %v431_v27, %v431_v27 }
 0x2d7   : > { %508 = vrot.lane.b32.xlu0 %v440_v28, %s1660_s17 }
 0x2d8   : > { %v437_v29 = vpop.permute.xlu1 %436 }
 0x2d9   : > { %v442_v30 = vpack.c.bf16 %v437_v29, %v437_v29 }
 0x2db   : > { %606 = vrot.lane.b32.xlu1 %v442_v30, %s1660_s17 }
 0x2dc   : > { %v434_v32 = vpop.permute.xlu1 %433 }
 0x2dd   : > { %v441_v33 = vpack.c.bf16 %v434_v32, %v434_v32 }
 0x2df   : > { %458 = vrot.lane.b32.xlu1 %v439_v31, %s1660_s17 }
 0x2e3   : > { %557 = vrot.lane.b32.xlu1 %v441_v33, %s1660_s17  ;;  %s322_s17 = scalar_lea.vmem [#allocation7], %s1276_s25 }
 0x2e4   : > { %s1187_s10 = sshll.u32 %s322_s17, 4  ;;  %s1974_s10 = int_to_ptr.vmem [resolvable:$true] %s1187_s10 }
 0x349   : > { %v509_v34 = vpop.permute.xlu0 %508 }
 0x34a   : > { %v514_v35 = vsel %vm460_vm2, %v509_v34, 0 }
 0x34b   : > { %1352 = vmatpush3.bf16.xpose.msra.mxu0 %v514_v35 }
 0x34c   : > { %1363 = vmatprep.subr.bf16.mxu0 %v1658_v26 }
 0x34d   : > { %v607_v36 = vpop.permute.xlu1 %606 }
 0x34e   : > { %v612_v38 = vsel %vm460_vm2, %v607_v36, 0 }
 0x351   : > { %v459_v37 = vpop.permute.xlu1 %458 }
 0x352   : > { %1354 = vmatmul.mubr.msk.bf16.vlgmr.msra.gmra.mrb[4].mxu0 %vm460_vm2, %v440_v28  ;;  %v465_v39 = vsel %vm460_vm2, %v459_v37, 0 }
 0x353   : > { %1346 = vmatpush3.bf16.xpose.msra.mxu1 %v465_v39  ;;  %1364 = vmatpush3.bf16.xpose.msra.mxu0 %v612_v38 }
 0x354   : > { %1365 = vmatprep.mubr.msk.bf16.mxu0 %vm1659_vm1, %v1658_v26  ;;  %1357 = vmatprep.subr.bf16.mxu1 %v1658_v26 }
 0x355   : > { %1375 = vmatprep.subr.bf16.mxu0 %v1658_v26  ;;  %v558_v40 = vpop.permute.xlu1 %557 }
 0x356   : > { %v563_v41 = vsel %vm460_vm2, %v558_v40, 0 }
 0x35a   : > { %1348 = vmatmul.mubr.msk.bf16.vlgmr.msra.gmra.mrb[0].mxu1 %vm460_vm2, %v439_v31  ;;  %1366 = vmatmul.mubr.msk.bf16.vlgmr.msra.gmra.mrb[8].mxu0 %vm460_vm2, %v442_v30 }
 0x35b   : > { %1358 = vmatpush3.bf16.xpose.msra.mxu1 %v563_v41  ;;  %1359 = vmatprep.mubr.msk.bf16.mxu1 %vm1659_vm1, %v1658_v26 }
 0x35c   : > { %1369 = vmatprep.subr.bf16.mxu1 %v1658_v26  ;;  %1377 = vmatprep.mubr.msk.bf16.mxu0 %vm1659_vm1, %v1658_v26 }
 0x362   : > { %1360 = vmatmul.mubr.msk.bf16.vlgmr.msra.gmra.mrb[4].mxu1 %vm460_vm2, %v441_v33 }
 0x363   : > { %1370 = vmatpush3.bf16.msra.mxu1 %v708_v43  ;;  %1371 = vmatprep.mubr.msk.bf16.mxu1 %vm1659_vm1, %v1658_v26 }
 0x364   : > { %1381 = vmatprep.subr.bf16.mxu1 %v1658_v26 }
 0x425   : > { %v550_v44 = vpop.f32.mrb[4].mxu0 }
 0x426   : > { %v1355_v45 = vpop.f32.mrb[5].mxu0  ;;  %v658_v46 = vsel %vm654_vm4, %v550_v44, -inf }
 0x427   : > { %659 = vmax.xlane.f32.xlu1 %v658_v46  ;;  %v553_v47 = vpop.f32.mrb[6].mxu0 }
 0x428   : > { %v1356_v48 = vpop.f32.mrb[7].mxu0  ;;  %v1496_v47 = vld [vmem:[%s2019_s4] sm:$0xff]  }
 0x429   : > { %v1497_v48 = vld [vmem:[%s2019_s4 + $0x8] sm:$0xff]  }
 0x42d   : > { %v501_v49 = vpop.f32.mrb[0].mxu1  ;;  %v648_v50 = vpop.f32.mrb[8].mxu0 }
 0x42e   : > { %v1349_v51 = vpop.f32.mrb[1].mxu1  ;;  %v1367_v52 = vpop.f32.mrb[9].mxu0  ;;  %v655_v53 = vsel %vm654_vm4, %v501_v49, -inf  ;;  %v664_v54 = vsel %vm654_vm4, %v648_v50, -inf }
 0x42f   : > { %v504_v55 = vpop.f32.mrb[2].mxu1  ;;  %656 = vmax.xlane.f32.xlu1 %v655_v53  ;;  %665 = vmax.xlane.f32.xlu0 %v664_v54  ;;  %v651_v56 = vpop.f32.mrb[10].mxu0 }
 0x430   : > { %v1350_v57 = vpop.f32.mrb[3].mxu1  ;;  %v1368_v58 = vpop.f32.mrb[11].mxu0 }
 0x435   : > { %v599_v59 = vpop.f32.mrb[4].mxu1 }
 0x436   : > { %v1361_v60 = vpop.f32.mrb[5].mxu1  ;;  %v661_v61 = vsel %vm654_vm4, %v599_v59, -inf }
 0x437   : > { %v602_v62 = vpop.f32.mrb[6].mxu1  ;;  %662 = vmax.xlane.f32.xlu0 %v661_v61 }
 0x438   : > { %v1362_v63 = vpop.f32.mrb[7].mxu1 }
 0x4b4   : > { %v660_v0 = vpop.xlane.xlu1 %659 }
 0x4b5   : > { %v668_v1 = vsub.f32 %v550_v44, %v660_v0 }
 0x4b7   : > { %v673_v2 = vmul.f32 1.442695, %v668_v1 }
 0x4b9   : > { %1504 = vpow2.f32 %v673_v2 }
 0x4bc   : > { %v666_v3 = vpop.xlane.xlu0 %665  ;;  %v657_v10 = vpop.xlane.xlu1 %656 }
 0x4bd   : > { %v670_v4 = vsub.f32 %v648_v50, %v666_v3  ;;  %v667_v11 = vsub.f32 %v501_v49, %v657_v10  ;;  %v1498_v3 = vld [vmem:[%s2019_s4 + $0x10] sm:$0xff]   ;;  %v1293_v10 = vld [vmem:[%s2020_s5] ss:$0 sm:$0xff] }
 0x4bf   : > { %v677_v5 = vmul.f32 1.442695, %v670_v4  ;;  %v671_v12 = vmul.f32 1.442695, %v667_v11 }
 0x4c1   : > { %1506 = vpow2.f32 %v677_v5  ;;  %v1499_v5 = vld [vmem:[%s2019_s4 + $0x18] sm:$0xff]  }
 0x4c2   : > { %1508 = vpow2.f32 %v671_v12 }
 0x4c3   : > { %v1505_v6 = vpop.eup %1504 }
 0x4c4   : > { %v682_v7 = vsel %vm654_vm4, %v1505_v6, 0.0  ;;  %v663_v13 = vpop.xlane.xlu0 %662 }
 0x4c5   : > { %683 = vadd.xlane.f32.xlu1 %v682_v7  ;;  %v669_v14 = vsub.f32 %v599_v59, %v663_v13 }
 0x4c7   : > { %v675_v15 = vmul.f32 1.442695, %v669_v14 }
 0x4c9   : > { %1510 = vpow2.f32 %v675_v15 }
 0x4cb   : > { %v1507_v8 = vpop.eup %1506 }
 0x4cc   : > { %v688_v9 = vsel %vm654_vm4, %v1507_v8, 0.0  ;;  %v1509_v16 = vpop.eup %1508 }
 0x4cd   : > { %689 = vadd.xlane.f32.xlu0 %v688_v9  ;;  %v679_v17 = vsel %vm654_vm4, %v1509_v16, 0.0  ;;  %v1500_v9 = vld [vmem:[%s2021_s6] sm:$0xff]  }
 0x4d3   : > { %v1511_v18 = vpop.eup %1510 }
 0x4d4   : > { %v685_v19 = vsel %vm654_vm4, %v1511_v18, 0.0 }
 0x4d6   : > { %444 = vrot.lane.b32.xlu1 %v1855_v23, %s1655_s22 }
 0x4e3   : > { %450 = vrot.lane.b32.xlu0 %v1855_v23, %s1656_s21 }
 0x4fa   : > { %680 = vadd.xlane.f32.xlu1 %v679_v17  ;;  %v1305_v17 = vld [vmem:[%s2020_s5 + $0x1] ss:$0 sm:$0xff] }
 0x502   : > { %686 = vadd.xlane.f32.xlu0 %v685_v19 }
 0x50b   : > { %447 = vrot.lane.b32.xlu1 %v1855_v23, %s1657_s26  ;;  %s1316_s26 = sshll.u32 %s1730_s9, 7  ;;  %s1174_s9 = scalar_lea.sflag [#allocation4], %s320_s24 }
 0x50c   : > { %s1972_s18 = scalar_lea.hbm %s2023_s8, %s1316_s26 }
 0x552   : > { %v684_v21 = vpop.xlane.xlu1 %683 }
 0x553   : > { %1512 = vrcp.f32 %v684_v21 }
 0x556   : > { %v445_v22 = vpop.permute.xlu1 %444 }
 0x557   : > { %v454_v24 = vpack.c.bf16 %v445_v22, %v445_v22 }
 0x559   : > { %v754_v25 = vsel %vm706_vm3, %v454_v24, 0 }
 0x55a   : > { %1376 = vmatpush3.bf16.msra.mxu0 %v754_v25  ;;  %v690_v27 = vpop.xlane.xlu0 %689 }
 0x55b   : > { %1387 = vmatprep.subr.bf16.mxu0 %v1658_v26  ;;  %1514 = vrcp.f32 %v690_v27 }
 0x55d   : > { %v1513_v28 = vpop.eup %1512 }
 0x55e   : > { %v696_v29 = vmul.f32 %v1513_v28, %v1505_v6  ;;  %v451_v30 = vpop.permute.xlu0 %450 }
 0x55f   : > { %v456_v31 = vpack.c.bf16 %v451_v30, %v451_v30 }
 0x560   : > { %v700_v32 = vpack.c.bf16 %v696_v29, %v696_v29 }
 0x561   : > { %v846_v33 = vsel %vm706_vm3, %v456_v31, 0  ;;  %v1501_v31 = vld [vmem:[%s2021_s6 + $0x8] sm:$0xff]  }
 0x562   : > { %1378 = vmatmul.mubr.msk.bf16.vlgmr.msra.gmra.mrb[12].mxu0 %vm654_vm4, %v700_v32 }
 0x563   : > { %1388 = vmatpush3.bf16.msra.mxu0 %v846_v33  ;;  %1389 = vmatprep.mubr.msk.bf16.mxu0 %vm1659_vm1, %v1658_v26 }
 0x564   : > { %1401 = vmatprep.subr.bf16.mxu0 %v1658_v26 }
 0x565   : > { %v1515_v23 = vpop.eup %1514 }
 0x566   : > { %v698_v34 = vmul.f32 %v1515_v23, %v1507_v8 }
 0x568   : > { %v702_v35 = vpack.c.bf16 %v698_v34, %v698_v34 }
 0x56a   : > { %1390 = vmatmul.mubr.msk.bf16.vlgmr.msra.gmra.mrb[16].mxu0 %vm654_vm4, %v702_v35 }
 0x56b   : > { %1403 = vmatprep.mubr.msk.bf16.mxu0 %vm1659_vm1, %v1658_v26  ;;  %1402 = vmatpush3.bf16.msra.mxu0 %v1500_v9 }
 0x56c   : > { %1415 = vmatprep.subr.bf16.mxu0 %v1658_v26 }
 0x587   : > { %v681_v36 = vpop.xlane.xlu1 %680 }
 0x588   : > { %1516 = vrcp.f32 %v681_v36 }
 0x58b   : > { %v448_v37 = vpop.permute.xlu1 %447 }
 0x58c   : > { %v455_v41 = vpack.c.bf16 %v448_v37, %v448_v37 }
 0x58e   : > { %v800_v43 = vsel %vm706_vm3, %v455_v41, 0  ;;  %v1312_v41 = vld [vmem:[%s2022_s7 + $0x1] ss:$0 sm:$0xff] }
 0x58f   : > { %v687_v38 = vpop.xlane.xlu0 %686 }
 0x590   : > { %1518 = vrcp.f32 %v687_v38 }
 0x592   : > { %v1517_v39 = vpop.eup %1516 }
 0x593   : > { %v695_v40 = vmul.f32 %v1517_v39, %v1509_v16 }
 0x595   : > { %v699_v42 = vpack.c.bf16 %v695_v40, %v695_v40 }
 0x597   : > { %1372 = vmatmul.mubr.msk.bf16.vlgmr.msra.gmra.mrb[8].mxu1 %vm654_vm4, %v699_v42 }
 0x598   : > { %1382 = vmatpush3.bf16.msra.mxu1 %v800_v43  ;;  %1383 = vmatprep.mubr.msk.bf16.mxu1 %vm1659_vm1, %v1658_v26 }
 0x599   : > { %1393 = vmatprep.subr.bf16.mxu1 %v1658_v26 }
 0x59a   : > { %v1519_v44 = vpop.eup %1518 }
 0x59b   : > { %v697_v45 = vmul.f32 %v1519_v44, %v1511_v18 }
 0x59d   : > { %v701_v46 = vpack.c.bf16 %v697_v45, %v697_v45 }
 0x59f   : > { %1384 = vmatmul.mubr.msk.bf16.vlgmr.msra.gmra.mrb[12].mxu1 %vm654_vm4, %v701_v46 }
 0x5a0   : > { %1397 = vmatprep.mubr.msk.bf16.mxu1 %vm1659_vm1, %v1658_v26  ;;  %1394 = vmatpush3.bf16.msra.mxu1 %v1496_v47  ;;  %v1297_v47 = vld [vmem:[%s2022_s7] ss:$0 sm:$0xff] }
 0x5a1   : > { %1395 = vmatprep.subr.bf16.mxu1 %v1658_v26 }
 0x5a4   : > { %1396 = vmatpush3.bf16.msra.mxu1 %v1497_v48 }
 0x5a5   : > { %1407 = vmatprep.subr.bf16.mxu1 %v1658_v26 }
 0x635   : > { %v790_v49 = vpop.f32.mrb[12].mxu0 }
 0x636   : > { %889 = vrot.lane.b32.xlu0 %v790_v49, %s1661_s20  ;;  %v1379_v50 = vpop.f32.mrb[13].mxu0 }
 0x637   : > { %v793_v51 = vpop.f32.mrb[14].mxu0 }
 0x638   : > { %v1380_v52 = vpop.f32.mrb[15].mxu0 }
 0x63d   : > { %v882_v53 = vpop.f32.mrb[16].mxu0 }
 0x63e   : > { %1026 = vrot.lane.b32.xlu1 %v882_v53, %s1661_s20  ;;  %v1391_v54 = vpop.f32.mrb[17].mxu0  ;;  %s1580_s20 = scalar_lea.vmem %s1974_s10, 128 }
 0x63f   : > { %v885_v55 = vpop.f32.mrb[18].mxu0  ;;  %p1581_p12 = scmp.ne.s32.totalorder %s1974_s10, %s1580_s20 }
 0x640   : > { %v1392_v56 = vpop.f32.mrb[19].mxu0 }
 0x641   : > { %p1582_p2 = pnand %p1581_p12, %p2036_p1 }
 0x643   : > { %p1583_p3 = pneg %p1582_p2 }
 0x66a   : > { %v744_v57 = vpop.f32.mrb[8].mxu1 }
 0x66b   : > { %v1373_v58 = vpop.f32.mrb[9].mxu1 }
 0x66c   : > { %v747_v59 = vpop.f32.mrb[10].mxu1 }
 0x66d   : > { %v1374_v60 = vpop.f32.mrb[11].mxu1 }
 0x672   : > { %v836_v61 = vpop.f32.mrb[12].mxu1 }
 0x673   : > { %v1385_v62 = vpop.f32.mrb[13].mxu1 }
 0x674   : > { %v839_v63 = vpop.f32.mrb[14].mxu1 }
 0x675   : > { %v1386_v0 = vpop.f32.mrb[15].mxu1 }
 0x6a8   : > { %v890_v1 = vpop.permute.xlu0 %889 }
 0x6a9   : > { %v892_v2 = vsel %vm460_vm2, %v744_v57, %v890_v1 }
 0x6aa   : > { %v893_v4 = vpack.c.bf16 %v892_v2, %v892_v2 }
 0x6ac   : > { %1398 = vmatmul.mubr.msk.bf16.vlgmr.msra.gmra.mrb[16].mxu1 %vm329_vm0, %v893_v4 }
 0x6ad   : > { %1408 = vmatpush3.bf16.msra.mxu1 %v1498_v3  ;;  %1411 = vmatprep.mubr.msk.bf16.mxu1 %vm1659_vm1, %v1658_v26 }
 0x6ae   : > { %1409 = vmatprep.subr.bf16.mxu1 %v1658_v26 }
 0x6b0   : > { %v1027_v6 = vpop.permute.xlu1 %1026 }
 0x6b1   : > { %1410 = vmatpush3.bf16.msra.mxu1 %v1499_v5  ;;  %v1029_v7 = vsel %vm460_vm2, %v836_v61, %v1027_v6 }
 0x6b2   : > { %v1030_v8 = vpack.c.bf16 %v1029_v7, %v1029_v7 }
 0x6b4   : > { %1412 = vmatmul.mubr.msk.bf16.vlgmr.msra.gmra.mrb[20].mxu1 %vm329_vm0, %v1030_v8 }
 0x77f   : > { %v954_v11 = vpop.f32.mrb[16].mxu1 }
 0x780   : > { %v955_v12 = vadd.f32 %v1293_v10, %v954_v11  ;;  %v1399_v13 = vpop.f32.mrb[17].mxu1 }
 0x781   : > { %v957_v14 = vpop.f32.mrb[18].mxu1 }
 0x782   : > { %v961_v15 = vmul.f32 0.70710677, %v955_v12  ;;  %v1400_v16 = vpop.f32.mrb[19].mxu1  ;;  %v960_v28 = vmul.f32 0.5, %v955_v12 }
 0x784   : > { %1520 = verf.f32 %v961_v15 }
 0x787   : > { %v1093_v18 = vpop.f32.mrb[20].mxu1 }
 0x788   : > { %v1094_v19 = vadd.f32 %v1305_v17, %v1093_v18  ;;  %v1413_v21 = vpop.f32.mrb[21].mxu1 }
 0x789   : > { %v1096_v22 = vpop.f32.mrb[22].mxu1 }
 0x78a   : > { %v1100_v24 = vmul.f32 0.70710677, %v1094_v19  ;;  %v1414_v25 = vpop.f32.mrb[23].mxu1  ;;  %v1099_v23 = vmul.f32 0.5, %v1094_v19 }
 0x78c   : > { %1522 = verf.f32 %v1100_v24 }
 0x78e   : > { %v1521_v27 = vpop.eup %1520 }
 0x78f   : > { %v963_v29 = vadd.f32 1.0, %v1521_v27 }
 0x791   : > { %v964_v30 = vmul.f32 %v963_v29, %v960_v28 }
 0x793   : > { %v965_v32 = vpack.c.bf16 %v964_v30, %v964_v30 }
 0x795   : > { %1404 = vmatmul.mubr.msk.bf16.vlgmr.msra.gmra.mrb[20].mxu0 %vm460_vm2, %v965_v32 }
 0x796   : > { %1416 = vmatpush3.bf16.msra.mxu0 %v1501_v31  ;;  %1417 = vmatprep.mubr.msk.bf16.mxu0 %vm1659_vm1, %v1658_v26  ;;  %v1523_v33 = vpop.eup %1522 }
 0x797   : > { %v1102_v34 = vadd.f32 1.0, %v1523_v33 }
 0x799   : > { %v1103_v35 = vmul.f32 %v1102_v34, %v1099_v23 }
 0x79b   : > { %v1104_v36 = vpack.c.bf16 %v1103_v35, %v1103_v35 }
 0x79d   : > { %1418 = vmatmul.mubr.msk.bf16.vlgmr.msra.gmra.mrb[24].mxu0 %vm460_vm2, %v1104_v36 }
 0x868   : > { %v1018_v37 = vpop.f32.mrb[20].mxu0 }
 0x869   : > { %v1405_v38 = vpop.f32.mrb[21].mxu0  ;;  %v1019_v48 = vadd.f32 %v1297_v47, %v1018_v37 }
 0x86a   : > { %v1021_v39 = vpop.f32.mrb[22].mxu0 }
 0x86b   : > { %v1406_v40 = vpop.f32.mrb[23].mxu0  ;;  %v1024_v49 = vadd.f32 %v1019_v48, %v1849_v20 }
 0x870   : > { %v1159_v42 = vpop.f32.mrb[24].mxu0 }
 0x871   : > { %v1160_v43 = vadd.f32 %v1312_v41, %v1159_v42  ;;  %v1419_v26 = vpop.f32.mrb[25].mxu0 }
 0x872   : > { %v1162_v44 = vpop.f32.mrb[26].mxu0 }
 0x873   : > { %v1165_v45 = vadd.f32 %v1160_v43, %v1849_v20  ;;  %v1420_v46 = vpop.f32.mrb[27].mxu0 }
 0x875   : > { %1167 = vrot.lane.b32.xlu1 %v1165_v45, %s1662_s23  ;;  %s1584_s23 = sshll.u32 %s1663_s19, 4  ;;  %s1585_s23 = int_to_ptr.vmem [resolvable:$false] %s1584_s23 }
 0x876   : > { %s1586_s25 = scalar_lea.vmem %s1585_s23, 256  ;;  %p1587_p4 = scmp.lt.s32.totalorder %s1974_s10, %s1585_s23 }
 0x877   : > { %p1588_p7 = scmp.lt.s32.totalorder %s1586_s25, %s1580_s20 }
 0x879   : > { %p1589_p8 = por %p1588_p7, %p1587_p4 }
 0x87b   : > { %p1590_p11 = pnand %p1589_p8, %p1583_p3 }
 0x8e7   : > { %v1168_v50 = vpop.permute.xlu1 %1167 }
 0x8e8   : > { %v1170_v51 = vsel %vm329_vm0, %v1024_v49, %v1168_v50 }
 0x8e9   : > { %1172 = vst.msk [vmem:[%s322_s17] sm:$0xff] %vm1171_vm5, %v1170_v51 }
 0x8ea   : > { %1593 = shalt.err (!%p1590_p11)
}
 0x8eb   : > { %s1594_s24 = scalar_lea.hbm %s1972_s18, 128  ;;  %s1598_s26 = scalar_lea.hbm %s2023_s8, 256 }
 0x8ec   : > { %p1595_p13 = scmp.ne.s32.totalorder %s1972_s18, %s1594_s24  ;;  %p1599_p5 = scmp.lt.u32.totalorder %s1972_s18, %s2023_s8 }
 0x8ed   : > { %p1600_p9 = scmp.lt.u32.totalorder %s1598_s26, %s1594_s24  ;;  %p1602_p12 = scmp.lt.u32.totalorder %s1594_s24, %s1972_s18 }
 0x8ee   : > { %p1596_p0 = pnand %p1595_p13, %p2036_p1 }
 0x8ef   : > { %p1601_p10 = por %p1600_p9, %p1599_p5 }
 0x8f0   : > { %p1597_p6 = pneg %p1596_p0 }
 0x8f1   : > { %p1603_p2 = por %p1602_p12, %p1601_p10 }
 0x8f3   : > { %p1604_p3 = pnand %p1603_p2, %p1597_p6 }
 0x8f5   : > { %1607 = shalt.err (!%p1604_p3)
}
 0x8f6   : > { %1429 = dma.vmem_to_hbm [thread:$0]  (%p2036_p1), %s1974_s10, 128, %s1972_s18, %s1174_s9  }
 0x8f7 PF: > { %p1446_p4 = scmp.ge.s32.totalorder %s1650_s30, 2  ;;  %s1199_s13 = sand.u32 1, %s1638_s27  }
 0x8f8   : > { %p2037_p7 = scmp.ne.s32.totalorder %s2028_s16, 0  ;;  %s1200_s20 = scalar_lea.sflag [#allocation4], %s1199_s13 }
 0x8fa   : > { %p1439_p8 = pnand %p1446_p4, %p2037_p7 }
 0x8fc   : > { %1633 = dma.done.wait (!%p1439_p8), %s1200_s20, 128  }
 0x8fd   : > { %1635 = vsyncadd (!%p1439_p8), %s1200_s20, 4294967168  ;;  %p20_p11 = scmp.ge.s32.totalorder %s1734_s11, 4   ;;  %s2038_s27 = smov %s1642_s28 }
 0x8fe   : > { %s2039_s28 = smov %s1646_s29  ;;  %s2040_s29 = smov %s1745_s14 }
 0x8ff   : > { %s2041_s30 = smov %s1734_s11  ;;  %22 = sbr.rel (!%p20_p11) target bundleno = 5 (0x5), region = 100 }
 0x906   :  { %1205 = vsyncpa [#allocation3], 1 }
 0x907   :  { %1207 = vsyncpa [#allocation3 + $0x1], 1 }
 0x908   :  { %1208 = vsyncpa [#allocation6], 1 }
 0x909   :  { %1209 = vsyncpa [#allocation4], 1 }
 0x90a   :  { %1211 = vsyncpa [#allocation4 + $0x1], 1 }

</bundles_post_ra>
